<compile_context>
chip_gen: v6e
topology: v6e:2x2x1
jax: 0.10.0
libtpu: 0.0.40
codegen_flags: <defaults>
</compile_context>

<pallas_src>
import functools

import numpy as np
import jax
import jax.numpy as jnp
from jax import lax
from jax.experimental import pallas as pl
from jax.experimental.pallas import tpu as pltpu


def _asff_conv_kernel(x_ref, w_ref, mask_ref, b_ref, o_ref, *scratch,
                      H, W, K, use_act):
    """Fused KxK conv (stride 1, 'same' pad) + folded BN + SiLU, CHW layout.

    x_ref    : (1, Cin, L)   L = (H + 2*pad)*W + 2*pad, zero padded + flattened
    w_ref    : (Cout, K*K*Cin)  BN scale already folded in
    mask_ref : (K, H*W)      column-validity mask per horizontal tap
    b_ref    : (Cout, 1)     folded BatchNorm bias
    o_ref    : (1, Cout, H*W)
    scratch  : () for K == 1, else ((K*K*Cin, H*W) VMEM patch buffer,)
    """
    HW = H * W
    pad = K // 2
    x = x_ref[0]                                    # (Cin, L), loaded once

    if K == 1:
        patches = x                                  # 1x1 conv: L == HW
    else:
        patch_ref = scratch[0]
        cin = x.shape[0]
        m = mask_ref[...]                            # (K, HW), loaded once
        for ky in range(K):
            for kx in range(K):
                t = ky * K + kx
                start = ky * W + kx                  # contiguous lane slice
                sl = x[:, start:start + HW]          # (Cin, HW) shifted view
                if kx != pad:                        # kill column wrap-around
                    sl = sl * m[kx:kx + 1, :]
                patch_ref[t * cin:(t + 1) * cin, :] = sl
        patches = patch_ref[...]                     # (K*K*Cin, HW)

    # single fused im2col matmul on the MXU, lane-dense (Cout, HW) result
    y = jnp.dot(w_ref[...], patches, preferred_element_type=jnp.float32)
    y = y + b_ref[...]                               # folded BN bias
    if use_act:
        y = y * jax.nn.sigmoid(y)                    # SiLU
    o_ref[0] = y.astype(o_ref.dtype)


def asff_conv_forward(x_nchw, w_pt, bn_scale, bn_bias, *, kernel=1, act=True):
    """ASFFConv forward.  x: (N, Cin, H, W) NCHW, w_pt: (Cout, Cin, K, K)."""
    N, C_in, H, W = x_nchw.shape
    C_out, c_in_w, K, K2 = w_pt.shape
    assert c_in_w == C_in and K == K2 == kernel and K % 2 == 1
    pad = K // 2
    HW = H * W
    L = (H + 2 * pad) * W + 2 * pad

    # ---- wrapper-side layout plumbing (HBM only, done once per call) ----
    # pad rows, flatten spatial, pad the flat axis -> every tap is a contiguous
    # length-HW slice inside the kernel.
    xp = jnp.pad(x_nchw, ((0, 0), (0, 0), (pad, pad), (0, 0)))
    xp = xp.reshape(N, C_in, (H + 2 * pad) * W)
    xp = jnp.pad(xp, ((0, 0), (0, 0), (pad, pad)))

    # weights -> (Cout, K*K*Cin), row order = (tap-major, then cin), matching
    # the patch buffer built in the kernel.  Fold the per-channel BN scale in
    # here (tiny tensor, reused across the whole grid).
    w2d = jnp.transpose(w_pt, (0, 2, 3, 1)).reshape(C_out, K * K * C_in)
    w2d = (w2d * bn_scale.reshape(C_out, 1)).astype(jnp.float32)

    # column-validity masks for horizontal taps (left/right edges).
    col = np.arange(HW, dtype=np.int64) % W
    masks = np.stack(
        [((col + (kx - pad) >= 0) & (col + (kx - pad) < W)) for kx in range(K)],
        axis=0).astype(np.float32)
    masks = jnp.asarray(masks)                        # (K, HW)

    b2d = bn_bias.reshape(C_out, 1).astype(jnp.float32)

    kern = functools.partial(_asff_conv_kernel, H=H, W=W, K=K,
                             use_act=bool(act))
    scratch = [] if K == 1 else [pltpu.VMEM((K * K * C_in, HW), jnp.float32)]

    y_flat = pl.pallas_call(
        kern,
        out_shape=jax.ShapeDtypeStruct((N, C_out, HW), x_nchw.dtype),
        grid_spec=pltpu.PrefetchScalarGridSpec(
            num_scalar_prefetch=0,
            grid=(N,),
            in_specs=[
                pl.BlockSpec((1, C_in, L), lambda n: (n, 0, 0)),
                pl.BlockSpec((C_out, K * K * C_in), lambda n: (0, 0)),
                pl.BlockSpec((K, HW), lambda n: (0, 0)),
                pl.BlockSpec((C_out, 1), lambda n: (0, 0)),
            ],
            out_specs=pl.BlockSpec((1, C_out, HW), lambda n: (n, 0, 0)),
            scratch_shapes=scratch,
        ),
        compiler_params=pltpu.CompilerParams(
            dimension_semantics=("parallel",)),
    )(xp, w2d, masks, b2d)
    return y_flat.reshape(N, C_out, H, W)


def _ref_forward(x, w_pt, s, b, k, act):
    pad = k // 2
    y = lax.conv_general_dilated(
        x, w_pt, (1, 1), [(pad, pad), (pad, pad)],
        dimension_numbers=('NCHW', 'OIHW', 'NCHW'),
        precision=lax.Precision.HIGHEST)
    y = y * s[None, :, None, None] + b[None, :, None, None]
    if act:
        y = jax.nn.silu(y)
    return y


if __name__ == "__main__":
    key = jax.random.PRNGKey(0)
    N, C_in, H, W = 2, 4, 16, 16
    eps = 1e-5

    x = jax.random.normal(jax.random.fold_in(key, 0), (N, C_in, H, W),
                          jnp.float32)

    def make_params(subkey, c_in, c_out, k):
        ks = jax.random.split(subkey, 5)
        w = 0.3 * jax.random.normal(ks[0], (c_out, c_in, k, k), jnp.float32)
        g = 1.0 + 0.1 * jax.random.normal(ks[1], (c_out,), jnp.float32)
        beta = 0.1 * jax.random.normal(ks[2], (c_out,), jnp.float32)
        mean = 0.1 * jax.random.normal(ks[3], (c_out,), jnp.float32)
        var = 1.0 + 0.1 * jnp.abs(jax.random.normal(ks[4], (c_out,), jnp.float32))
        s = g / jnp.sqrt(var + eps)      # folded BN (inference / running stats)
        b = beta - mean * s
        return w, s, b

    # test both the default 1x1 ASFFConv and a 3x3 variant
    for cfg_id, (k, c_out) in enumerate([(1, 8), (3, 4)]):
        w, s, b = make_params(jax.random.fold_in(key, cfg_id + 1), C_in, c_out, k)
        y = jax.block_until_ready(
            asff_conv_forward(x, w, s, b, kernel=k, act=True))
        y_ref = _ref_forward(x, w, s, b, k, True)
        err = float(np.max(np.abs(np.asarray(y) - np.asarray(y_ref))))
        assert np.allclose(np.asarray(y), np.asarray(y_ref),
                           rtol=2e-2, atol=2e-2), (k, c_out, err)

    print("KERNEL_OK")
</pallas_src>

<mosaic_0001>
module attributes {stable_mosaic.version = 11 : i64} {
  func.func @_asff_conv_kernel(%arg0: i32, %arg1: memref<1x4x256xf32, #tpu.memory_space<vmem>>, %arg2: memref<8x4xf32, #tpu.memory_space<vmem>>, %arg3: memref<1x256xf32, #tpu.memory_space<vmem>>, %arg4: memref<8x1xf32, #tpu.memory_space<vmem>>, %arg5: memref<1x8x256xf32, #tpu.memory_space<vmem>>) attributes {dimension_semantics = [#tpu.dimension_semantics<parallel>], iteration_bounds = array<i64: 2>, scalar_prefetch = 0 : i64, scratch_operands = 0 : i64, tpu.core_type = #tpu.core_type<tc>, window_params = [{transform_indices = @transform_0, window_bounds = array<i64: 1, 4, 256>}, {pipeline_mode = #tpu.pipeline_mode<synchronous>, transform_indices = @transform_1, window_bounds = array<i64: 8, 4>}, {pipeline_mode = #tpu.pipeline_mode<synchronous>, transform_indices = @transform_2, window_bounds = array<i64: 1, 256>}, {pipeline_mode = #tpu.pipeline_mode<synchronous>, transform_indices = @transform_3, window_bounds = array<i64: 8, 1>}, {transform_indices = @transform_4, window_bounds = array<i64: 1, 8, 256>}]} {
    %c0 = arith.constant 0 : index
    %c0_0 = arith.constant 0 : index
    %c0_1 = arith.constant 0 : index
    %0 = vector.load %arg1[%c0, %c0_0, %c0_1] : memref<1x4x256xf32, #tpu.memory_space<vmem>>, vector<1x4x256xf32>
    %1 = vector.shape_cast %0 : vector<1x4x256xf32> to vector<4x256xf32>
    %c0_2 = arith.constant 0 : index
    %c0_3 = arith.constant 0 : index
    %2 = vector.load %arg2[%c0_2, %c0_3] : memref<8x4xf32, #tpu.memory_space<vmem>>, vector<8x4xf32>
    %cst = arith.constant dense<0.000000e+00> : vector<8x256xf32>
    %3 = tpu.matmul %2, %1, %cst {dimension_numbers = #tpu.dot_dimension_numbers<[1], [0], [0], [1], [0, 0, 1, 1], [], []>} : vector<8x4xf32>, vector<4x256xf32>, vector<8x256xf32> -> vector<8x256xf32>
    %c0_4 = arith.constant 0 : index
    %c0_5 = arith.constant 0 : index
    %4 = vector.load %arg4[%c0_4, %c0_5] : memref<8x1xf32, #tpu.memory_space<vmem>>, vector<8x1xf32>
    %5 = vector.broadcast %4 : vector<8x1xf32> to vector<8x256xf32>
    %6 = arith.addf %3, %5 : vector<8x256xf32>
    %7 = arith.negf %6 : vector<8x256xf32>
    %8 = math.exp %7 : vector<8x256xf32>
    %cst_6 = arith.constant 1.000000e+00 : f32
    %9 = vector.broadcast %cst_6 : f32 to vector<8x256xf32>
    %10 = arith.addf %9, %8 : vector<8x256xf32>
    %11 = arith.divf %9, %10 : vector<8x256xf32>
    %12 = arith.mulf %6, %11 : vector<8x256xf32>
    %c0_7 = arith.constant 0 : index
    %c0_8 = arith.constant 0 : index
    %c0_9 = arith.constant 0 : index
    %13 = vector.load %arg5[%c0_7, %c0_8, %c0_9] : memref<1x8x256xf32, #tpu.memory_space<vmem>>, vector<1x8x256xf32>
    %14 = vector.shape_cast %13 : vector<1x8x256xf32> to vector<8x256xf32>
    %15 = vector.shape_cast %12 : vector<8x256xf32> to vector<1x8x256xf32>
    tpu.vector_store %arg5[%c0_7, %c0_8, %c0_9], %15 {strides = array<i32>} : memref<1x8x256xf32, #tpu.memory_space<vmem>>, vector<1x8x256xf32>,
    return
  }
  func.func @transform_0(%arg0: i32) -> (i32, i32, i32) {
    %c0_i32 = arith.constant 0 : i32
    %c0_i32_0 = arith.constant 0 : i32
    %c0_i32_1 = arith.constant 0 : i32
    return %arg0, %c0_i32, %c0_i32_0 : i32, i32, i32
  }
  func.func @transform_1(%arg0: i32) -> (i32, i32) {
    %c0_i32 = arith.constant 0 : i32
    %c0_i32_0 = arith.constant 0 : i32
    %c0_i32_1 = arith.constant 0 : i32
    return %c0_i32, %c0_i32_0 : i32, i32
  }
  func.func @transform_2(%arg0: i32) -> (i32, i32) {
    %c0_i32 = arith.constant 0 : i32
    %c0_i32_0 = arith.constant 0 : i32
    %c0_i32_1 = arith.constant 0 : i32
    return %c0_i32, %c0_i32_0 : i32, i32
  }
  func.func @transform_3(%arg0: i32) -> (i32, i32) {
    %c0_i32 = arith.constant 0 : i32
    %c0_i32_0 = arith.constant 0 : i32
    %c0_i32_1 = arith.constant 0 : i32
    return %c0_i32, %c0_i32_0 : i32, i32
  }
  func.func @transform_4(%arg0: i32) -> (i32, i32, i32) {
    %c0_i32 = arith.constant 0 : i32
    %c0_i32_0 = arith.constant 0 : i32
    %c0_i32_1 = arith.constant 0 : i32
    return %arg0, %c0_i32, %c0_i32_0 : i32, i32, i32
  }
}

</mosaic_0001>

<bundles_post_ra>
// kernel: tpu_custom_call.1
= control target key start
LH: loop header
LB: loop body
LE: loop exit
PB: predicated region body
PF: predicated region fallthrough
CT: control target
= control target key end

     0   :  { %9 = vsyncpa [#allocation3], 0  ;;  %s629_s0 = inlined_call_operand.vmem [shape: f32[2,4,256], index: 0, kind: input, shape index: {}]   ;;  %s630_s1 = inlined_call_operand.vmem [shape: f32[8,4], index: 1, kind: input, shape index: {}]   ;;  %s631_s2 = inlined_call_operand.vmem [shape: f32[1,256], index: 2, kind: input, shape index: {}]   ;;  %s632_s3 = inlined_call_operand.vmem [shape: f32[8,1], index: 3, kind: input, shape index: {}]   ;;  %s633_s4 = inlined_call_operand.hbm [shape: f32[2,8,256], index: 4, kind: output, shape index: {}]  }
   0x1   :  { %11 = vsyncpa [#allocation3 + $0x1], 0  ;;  %s536_s15 = smov 0   ;;  %s538_s16 = smov 0  }
   0x2   :  { %s540_s17 = smov 0   ;;  %s542_s18 = smov 0  }
   0x3 LB: > { %s557_s2 = sadd.s32 4294967295, %s506_s18   ;;  %s376_s19 = sadd.s32 4294967294, %s506_s18   ;;  %s506_s18 = sphi %s542_s18, %s639_s18   ;;  %s502_s17 = sphi %s540_s17, %s638_s17   ;;  %s498_s16 = sphi %s538_s16, %s637_s16   ;;  %s494_s15 = sphi %s536_s15, %s636_s15  }
   0x4   : > { %s561_s20 = sadd.s32 1, %s506_s18   ;;  %s113_s21 = sadd.s32 1, %s502_s17 }
   0x5   : > { %s110_s22 = ssub.s32 %s506_s18, %s561_s20  ;;  %p123_p0 = scmp.ne.s32.totalorder %s502_s17, %s498_s16 }
   0x6   : > { %p111_p1 = scmp.eq.s32.totalorder %s110_s22, 0  ;;  %p124_p2 = scmp.eq.s32.totalorder %s557_s2, 1 }
   0x7   : > { %p129_p3 = scmp.ne.s32.totalorder %s498_s16, %s494_s15  ;;  %p130_p4 = scmp.eq.s32.totalorder %s376_s19, 1 }
   0x8   : > { %s572_s23 = scalar_select %p111_p1, %s502_s17, %s113_s21  }
   0x9   : > { %p574_p5 = por %p124_p2, %p123_p0  ;;  %p578_p6 = por %p130_p4, %p129_p3 }
   0xa   : > { %p379_p7 = scmp.ge.s32.totalorder %s506_s18, 1  ;;  %p165_p8 = scmp.lt.s32.totalorder %s506_s18, 3 }
   0xc   : > { %p166_p9 = pnand %p379_p7, %p165_p8 }
   0xd   : > { %p191_p10 = scmp.lt.s32.totalorder (!%p166_p9), %s557_s2, 1  ;;  %s188_s9 = sand.u32 (!%p166_p9), 1, %s498_s16  }
   0xe   : > { %169 = sbr.rel (%p166_p9) target bundleno = 272 (0x110), region = 36  ;;  %s380_s10 = sshll.u32 (!%p166_p9), %s188_s9, 4 }
   0xf   : > { %s394_s11 = sshll.u32 (!%p166_p9), %s557_s2, 8  ;;  %s190_s12 = scalar_lea.vmem (!%p166_p9), [#allocation2], %s380_s10 }
  0x10   : > { %s317_s13 = sshll.u32 (!%p166_p9), %s190_s12, 4  ;;  %s315_s21 = scalar_lea.hbm (!%p166_p9), %s633_s4, %s394_s11  ;;  %s318_s13 = int_to_ptr.vmem [resolvable:$true] %s317_s13 }
  0x11   : > { %s303_s22 = scalar_lea.sflag (!%p166_p9), [#allocation3], %s188_s9  ;;  %s446_s26 = scalar_lea.vmem (!%p166_p9), %s318_s13, 256 }
  0x12   : > { %p447_p11 = scmp.ne.s32.totalorder (!%p166_p9), %s318_s13, %s446_s26  ;;  %s510_s27 = smov (!%p166_p9), [#allocation2]  }
  0x13   : > { %v508_v0 = vmov 0.0   ;;  %v509_v1 = vmov 0   ;;  %v198_v2 = vld [vmem:[%s632_s3] sm:$0xff]  ;;  %s192_s28 = scalar_select %p191_p10, %s557_s2, 1  ;;  %vm210_vm0 = vcmask 1043456   ;;  %vm206_vm1 = vcmask 31744  }
  0x14   : > { %279 = vmatprep.mubr.f32.mxu0 %v508_v0  ;;  %436 = vset.pattern.permute.xlu0 %v509_v1  ;;  %v197_v5 = vld [vmem:[%s630_s1] sm:$0xff]  ;;  %p448_p12 = pnand %p447_p11, %p574_p5  ;;  %s450_s2 = sshll.u32 %s510_s27, 4  ;;  %s451_s2 = int_to_ptr.vmem [resolvable:$false] %s450_s2 }
  0x15   : > { %201 = vperm.xlu0 %436, %v198_v2   ;;  %s393_s29 = sshll.u32 %s192_s28, 3  ;;  %s452_s28 = scalar_lea.vmem %s451_s2, 512 }
  0x16   : > { %s195_s6 = scalar_lea.vmem %s629_s0, %s393_s29  ;;  %p449_p13 = pneg %p448_p12 }
  0x17   : > { %v196_v3 = vld [vmem:[%s195_s6] sm:$0xff]  ;;  %p453_p0 = scmp.lt.s32.totalorder %s318_s13, %s451_s2  ;;  %p454_p1 = scmp.lt.s32.totalorder %s452_s28, %s446_s26 }
  0x18   : > { %v205_v4 = vcombine.high %v196_v3, %v196_v3 }
  0x19   : > { %p455_p2 = por %p454_p1, %p453_p0 }
  0x1a   : > { %383 = vmatprep.subr.msk.mxu0 %vm210_vm0, %v205_v4 }
  0x1b   : > { %384 = vmatpush1.msk.msra.mxu0 %vm210_vm0, %v196_v3  ;;  %p456_p3 = pnand %p455_p2, %p449_p13 }
  0x1c   : > { %385 = vmatmul.mubr.msk.f32.vlgmr.msra.gmra.mxu0 %vm206_vm1, %v197_v5 }
  0x90   : > { %v202_v6 = vpop.permute.xlu0 %201 }
  0xdc   : > { %v281_v7 = vpop.f32.mrf.mxu0 }
  0xdd   : > { %v282_v8 = vadd.f32 %v281_v7, %v202_v6 }
  0xde   : > { %v283_v9 = vpop.f32.mrf.mxu0 }
  0xdf   : > { %v386_v10 = vmul.f32 -1.442695, %v282_v8  ;;  %v284_v11 = vadd.f32 %v283_v9, %v202_v6 }
  0xe1   : > { %438 = vpow2.f32 %v386_v10  ;;  %v387_v12 = vmul.f32 -1.442695, %v284_v11 }
  0xe3   : > { %440 = vpow2.f32 %v387_v12 }
  0xee   : > { %v439_v13 = vpop.eup %438 }
  0xef   : > { %v292_v14 = vadd.f32 1.0, %v439_v13 }
  0xf0   : > { %v441_v15 = vpop.eup %440 }
  0xf1   : > { %442 = vrcp.f32 %v292_v14  ;;  %v293_v16 = vadd.f32 1.0, %v441_v15 }
  0xf3   : > { %444 = vrcp.f32 %v293_v16 }
  0xfe   : > { %v443_v17 = vpop.eup %442 }
  0xff   : > { %v298_v18 = vmul.f32 %v443_v17, %v282_v8 }
 0x100   : > { %v445_v19 = vpop.eup %444 }
 0x101   : > { %300 = vst [vmem:[%s190_s12] sm:$0xff] %v298_v18  ;;  %v299_v20 = vmul.f32 %v445_v19, %v284_v11 }
 0x103   : > { %301 = vst [vmem:[%s190_s12 + $0x8] sm:$0xff] %v299_v20 }
 0x104   : > { %459 = shalt.err (!%p456_p3)
}
 0x105   : > { %s460_s29 = scalar_lea.hbm %s315_s21, 256  ;;  %s464_s6 = scalar_lea.hbm %s633_s4, 512 }
 0x106   : > { %p461_p4 = scmp.ne.s32.totalorder %s315_s21, %s460_s29  ;;  %p465_p9 = scmp.lt.s32.totalorder %s315_s21, %s633_s4 }
 0x107   : > { %p466_p10 = scmp.lt.s32.totalorder %s464_s6, %s460_s29 }
 0x108   : > { %p462_p7 = pnand %p461_p4, %p574_p5 }
 0x109   : > { %p467_p11 = por %p466_p10, %p465_p9 }
 0x10a   : > { %p463_p8 = pneg %p462_p7 }
 0x10c   : > { %p468_p12 = pnand %p467_p11, %p463_p8 }
 0x10e   : > { %471 = shalt.err (!%p468_p12)
}
 0x10f   : > { %395 = dma.vmem_to_hbm [thread:$0]  (%p574_p5), %s318_s13, 256, %s315_s21, %s303_s22  }
 0x110 PF: > { %p401_p13 = scmp.ge.s32.totalorder %s506_s18, 2  ;;  %s329_s9 = sand.u32 1, %s494_s15  }
 0x111   : > { %s330_s10 = scalar_lea.sflag [#allocation3], %s329_s9 }
 0x112   : > { %p398_p0 = pnand %p401_p13, %p578_p6 }
 0x114   : > { %p399_p1 = pneg %p398_p0 }
 0x116   : > { %489 = dma.done.wait (%p399_p1), %s330_s10, 256  }
 0x117   : > { %491 = vsyncadd (%p399_p1), %s330_s10, 4294967040  ;;  %p14_p2 = scmp.ge.s32.totalorder %s561_s20, 4   ;;  %s636_s15 = smov %s498_s16 }
 0x118   : > { %s637_s16 = smov %s502_s17  ;;  %s638_s17 = smov %s572_s23 }
 0x119   : > { %s639_s18 = smov %s561_s20  ;;  %16 = sbr.rel (!%p14_p2) target bundleno = 3 (0x3), region = 71 }
 0x11e   :  { %335 = vsyncpa [#allocation3], 1 }
 0x11f   :  { %337 = vsyncpa [#allocation3 + $0x1], 1 }

</bundles_post_ra>
